<compile_context>
chip_gen: v7x
topology: tpu7x:2x2x1
jax: 0.10.0
libtpu: 0.0.40
codegen_flags: <defaults>
</compile_context>

<pallas_src>
import functools

import jax
import jax.numpy as jnp
from jax.experimental import pallas as pl
from jax.experimental.pallas import tpu as pltpu

GAMMA = 2.0   # fixed at module default (exploited: pow -> square)
ALPHA = 0.25
EPS = 1e-6

_LANE = 128          # TPU lane width
_MAX_TILE_R = 1024   # sublanes per grid step (f32 block ~512 KiB)


def _focal_kernel(p_ref, t_ref, acc_ref, *, n, tile_r, inner_blocks, needs_mask):
    # acc_ref is the output block; its block index depends only on the outer
    # ("parallel") axis, so it stays resident in VMEM across the inner
    # ("arbitrary") axis and acts as a vector accumulator (zeroed at i == 0).
    i = pl.program_id(1)

    @pl.when(i == 0)
    def _():
        acc_ref[...] = jnp.zeros_like(acc_ref)

    p = jnp.clip(p_ref[...].astype(jnp.float32), EPS, 1.0 - EPS)
    t = t_ref[...].astype(jnp.float32)
    pt = jnp.where(t == 1.0, p, 1.0 - p)
    one_m = 1.0 - pt
    # gamma == 2.0 -> explicit square on the VPU instead of pow (exp+log on EUP)
    loss = (-ALPHA) * (one_m * one_m) * jnp.log(pt)

    if not needs_mask:
        acc_ref[...] += loss
    else:
        block_elems = tile_r * _LANE
        b = pl.program_id(0) * inner_blocks + i        # logical block index
        block_start = b * block_elems
        is_full = block_start + block_elems <= n       # no padding in this block

        @pl.when(is_full)
        def _():
            acc_ref[...] += loss

        @pl.when(jnp.logical_not(is_full))
        def _():
            row = jax.lax.broadcasted_iota(jnp.int32, loss.shape, 0)
            col = jax.lax.broadcasted_iota(jnp.int32, loss.shape, 1)
            flat = block_start + row * _LANE + col
            acc_ref[...] += jnp.where(flat < n, loss, 0.0)


def focal_loss_for_probabilities(probabilities, targets):
    """Pallas TPU implementation of FocalLossForProbabilities.forward (mean)."""
    n = probabilities.size
    out_dtype = probabilities.dtype

    # Flatten; keep native dtype (cast to f32 inside the kernel).
    p = probabilities.reshape(-1)
    t = targets.reshape(-1)

    rows = pl.cdiv(n, _LANE)
    pad = rows * _LANE - n
    if pad:  # pad only to a lane multiple (<= 127 elems); masked in-kernel
        p = jnp.pad(p, (0, pad))
        t = jnp.pad(t, (0, pad))
    p2 = p.reshape(rows, _LANE)
    t2 = t.reshape(rows, _LANE)

    # Tile choice: single full-extent block for small inputs (always a legal
    # block shape), else big 1024-row tiles with a partial last block.
    tile_r = rows if rows <= _MAX_TILE_R else _MAX_TILE_R
    num_blocks = pl.cdiv(rows, tile_r)

    # Split row blocks into independent partial sums across the outer
    # ("parallel") axis -> both v7x TensorCores get work.
    num_partials = 2 if num_blocks >= 2 else 1
    inner = pl.cdiv(num_blocks, num_partials)

    # Any logically-visited element index >= n must be masked out (covers both
    # the lane pad in the last row and duplicated/clamped boundary blocks).
    needs_mask = (num_partials * inner * tile_r * _LANE) != n

    if num_partials * inner == num_blocks:
        def in_map(pi, i):
            return (pi * inner + i, 0)
    else:
        def in_map(pi, i):
            # Clamp out-of-range block indices; their contribution is fully
            # masked in-kernel (logical start >= n).
            return (jnp.minimum(pi * inner + i, num_blocks - 1), 0)

    kernel = functools.partial(
        _focal_kernel, n=n, tile_r=tile_r, inner_blocks=inner,
        needs_mask=needs_mask)

    acc = pl.pallas_call(
        kernel,
        out_shape=jax.ShapeDtypeStruct((num_partials * tile_r, _LANE),
                                       jnp.float32),
        grid_spec=pltpu.PrefetchScalarGridSpec(
            num_scalar_prefetch=0,
            grid=(num_partials, inner),
            in_specs=[
                pl.BlockSpec((tile_r, _LANE), in_map),
                pl.BlockSpec((tile_r, _LANE), in_map),
            ],
            out_specs=pl.BlockSpec((tile_r, _LANE), lambda pi, i: (pi, 0)),
        ),
        compiler_params=pltpu.CompilerParams(
            dimension_semantics=("parallel", "arbitrary")),
    )(p2, t2)

    # Final cross-lane reduction of the small per-partial accumulators in XLA.
    total = jnp.sum(acc)
    return (total / jnp.float32(n)).astype(out_dtype)


def _reference(probabilities, targets):
    # pure-JAX reference mirroring the PyTorch forward
    p = jnp.clip(probabilities.astype(jnp.float32), EPS, 1.0 - EPS)
    t = targets.astype(jnp.float32)
    pt = jnp.where(t == 1.0, p, 1.0 - p)
    loss = -ALPHA * (1.0 - pt) ** GAMMA * jnp.log(pt)
    return loss.mean()


if __name__ == "__main__":
    key = jax.random.PRNGKey(0)
    k1, k2, k3, k4 = jax.random.split(key, 4)

    # Main example: NCHW-like [2, 4, 16, 16]
    probs = jax.random.uniform(k1, (2, 4, 16, 16), dtype=jnp.float32)
    targets = (jax.random.uniform(k2, (2, 4, 16, 16)) > 0.5).astype(jnp.float32)
    out = focal_loss_for_probabilities(probs, targets)
    out = jax.block_until_ready(out)
    ref = _reference(probs, targets)
    assert jnp.allclose(out, ref, rtol=1e-5, atol=1e-6), (out, ref)

    # Extra sanity check: non-lane-aligned size -> exercises in-kernel masking.
    probs2 = jax.random.uniform(k3, (3, 5, 7, 11), dtype=jnp.float32)
    targets2 = (jax.random.uniform(k4, (3, 5, 7, 11)) > 0.5).astype(jnp.float32)
    out2 = focal_loss_for_probabilities(probs2, targets2)
    out2 = jax.block_until_ready(out2)
    ref2 = _reference(probs2, targets2)
    assert jnp.allclose(out2, ref2, rtol=1e-5, atol=1e-6), (out2, ref2)

    print("KERNEL_OK")
</pallas_src>

<mosaic_0001>
module attributes {stable_mosaic.version = 11 : i64} {
  func.func @_focal_kernel(%arg0: i32, %arg1: i32, %arg2: memref<16x128xf32, #tpu.memory_space<vmem>>, %arg3: memref<16x128xf32, #tpu.memory_space<vmem>>, %arg4: memref<16x128xf32, #tpu.memory_space<vmem>>) attributes {dimension_semantics = [#tpu.dimension_semantics<parallel>, #tpu.dimension_semantics<arbitrary>], iteration_bounds = array<i64: 1, 1>, scalar_prefetch = 0 : i64, scratch_operands = 0 : i64, tpu.core_type = #tpu.core_type<tc>, window_params = [{transform_indices = @transform_0, window_bounds = array<i64: 16, 128>}, {transform_indices = @transform_1, window_bounds = array<i64: 16, 128>}, {transform_indices = @transform_2, window_bounds = array<i64: 16, 128>}]} {
    %c0_i32 = arith.constant 0 : i32
    %0 = arith.cmpi eq, %arg1, %c0_i32 : i32
    %1 = arith.extui %0 : i1 to i32
    %c0_i32_0 = arith.constant 0 : i32
    %2 = arith.cmpi ne, %1, %c0_i32_0 : i32
    scf.if %2 {
      %cst_13 = arith.constant 0.000000e+00 : f32
      %24 = vector.broadcast %cst_13 : f32 to vector<16x128xf32>
      %c0_14 = arith.constant 0 : index
      %c0_15 = arith.constant 0 : index
      %25 = vector.load %arg4[%c0_14, %c0_15] : memref<16x128xf32, #tpu.memory_space<vmem>>, vector<16x128xf32>
      tpu.vector_store %arg4[%c0_14, %c0_15], %24 {strides = array<i32>} : memref<16x128xf32, #tpu.memory_space<vmem>>, vector<16x128xf32>,
    } else {
    }
    %c0 = arith.constant 0 : index
    %c0_1 = arith.constant 0 : index
    %3 = vector.load %arg2[%c0, %c0_1] : memref<16x128xf32, #tpu.memory_space<vmem>>, vector<16x128xf32>
    %cst = arith.constant 9.99999997E-7 : f32
    %cst_2 = arith.constant 0.999998986 : f32
    %4 = vector.broadcast %cst : f32 to vector<16x128xf32>
    %5 = arith.maximumf %4, %3 : vector<16x128xf32>
    %6 = vector.broadcast %cst_2 : f32 to vector<16x128xf32>
    %7 = arith.minimumf %6, %5 : vector<16x128xf32>
    %c0_3 = arith.constant 0 : index
    %c0_4 = arith.constant 0 : index
    %8 = vector.load %arg3[%c0_3, %c0_4] : memref<16x128xf32, #tpu.memory_space<vmem>>, vector<16x128xf32>
    %cst_5 = arith.constant 1.000000e+00 : f32
    %9 = vector.broadcast %cst_5 : f32 to vector<16x128xf32>
    %10 = arith.cmpf oeq, %8, %9 : vector<16x128xf32>
    %cst_6 = arith.constant 1.000000e+00 : f32
    %11 = vector.broadcast %cst_6 : f32 to vector<16x128xf32>
    %12 = arith.subf %11, %7 : vector<16x128xf32>
    %13 = arith.select %10, %7, %12 : vector<16x128xi1>, vector<16x128xf32>
    %cst_7 = arith.constant 1.000000e+00 : f32
    %14 = vector.broadcast %cst_7 : f32 to vector<16x128xf32>
    %15 = arith.subf %14, %13 : vector<16x128xf32>
    %16 = arith.mulf %15, %15 : vector<16x128xf32>
    %cst_8 = arith.constant -2.500000e-01 : f32
    %17 = vector.broadcast %cst_8 : f32 to vector<16x128xf32>
    %18 = arith.mulf %17, %16 : vector<16x128xf32>
    %19 = math.log %13 : vector<16x128xf32>
    %20 = arith.mulf %18, %19 : vector<16x128xf32>
    %c0_9 = arith.constant 0 : index
    %c0_10 = arith.constant 0 : index
    %21 = vector.load %arg4[%c0_9, %c0_10] : memref<16x128xf32, #tpu.memory_space<vmem>>, vector<16x128xf32>
    %22 = arith.addf %21, %20 : vector<16x128xf32>
    %c0_11 = arith.constant 0 : index
    %c0_12 = arith.constant 0 : index
    %23 = vector.load %arg4[%c0_11, %c0_12] : memref<16x128xf32, #tpu.memory_space<vmem>>, vector<16x128xf32>
    tpu.vector_store %arg4[%c0_11, %c0_12], %22 {strides = array<i32>} : memref<16x128xf32, #tpu.memory_space<vmem>>, vector<16x128xf32>,
    return
  }
  func.func @transform_0(%arg0: i32, %arg1: i32) -> (i32, i32) {
    %c1_i32 = arith.constant 1 : i32
    %0 = arith.muli %arg0, %c1_i32 : i32
    %1 = arith.addi %0, %arg1 : i32
    %c0_i32 = arith.constant 0 : i32
    %c0_i32_0 = arith.constant 0 : i32
    return %1, %c0_i32 : i32, i32
  }
  func.func @transform_1(%arg0: i32, %arg1: i32) -> (i32, i32) {
    %c1_i32 = arith.constant 1 : i32
    %0 = arith.muli %arg0, %c1_i32 : i32
    %1 = arith.addi %0, %arg1 : i32
    %c0_i32 = arith.constant 0 : i32
    %c0_i32_0 = arith.constant 0 : i32
    return %1, %c0_i32 : i32, i32
  }
  func.func @transform_2(%arg0: i32, %arg1: i32) -> (i32, i32) {
    %c0_i32 = arith.constant 0 : i32
    %c0_i32_0 = arith.constant 0 : i32
    return %arg0, %c0_i32 : i32, i32
  }
}

</mosaic_0001>

<bundles_post_ra>
// kernel: tpu_custom_call.1
= control target key start
LH: loop header
LB: loop body
LE: loop exit
PB: predicated region body
PF: predicated region fallthrough
CT: control target
= control target key end

     0   :  { %7 = vsyncpa [#allocation3], 0  ;;  %s255_s0 = inlined_call_operand.hbm [shape: f32[16,128], index: 0, kind: input, shape index: {}]   ;;  %s256_s1 = inlined_call_operand.hbm [shape: f32[16,128], index: 1, kind: input, shape index: {}]   ;;  %s257_s2 = inlined_call_operand.hbm [shape: f32[16,128], index: 2, kind: output, shape index: {}]  }
   0x1   :  { %8 = vsyncpa [#allocation6], 0 }
   0x2   :  { %9 = vsyncpa [#allocation4], 0  ;;  %s190_s9 = smov [#allocation2]   ;;  %s118_s13 = scalar_lea.hbm %s255_s0, 256 }
   0x3   :  { %s19_s10 = sshll.u32 %s190_s9, 4  ;;  %p119_p0 = scmp.ne.s32.totalorder %s255_s0, %s118_s13  ;;  %s20_s10 = int_to_ptr.vmem [resolvable:$true] %s19_s10 }
   0x4   :  { %p122_p1 = scmp.lt.u32.totalorder %s118_s13, %s255_s0 }
   0x6   :  { %p124_p2 = pnand %p122_p1, %p119_p0 }
   0x8   :  { %127 = shalt.err (!%p124_p2)
}
   0x9   :  { %s128_s18 = scalar_lea.vmem %s20_s10, 256  ;;  %p133_p4 = scmp.lt.s32.totalorder %s20_s10, %s20_s10 }
   0xa   :  { %p129_p3 = scmp.ne.s32.totalorder %s20_s10, %s128_s18  ;;  %p134_p5 = scmp.lt.s32.totalorder %s128_s18, %s128_s18 }
   0xc   :  { %p135_p6 = por %p134_p5, %p133_p4 }
   0xe   :  { %p136_p7 = pnand %p135_p6, %p129_p3 }
  0x10   :  { %139 = shalt.err (!%p136_p7)
}
  0x11   :  { %s191_s19 = smov 128   ;;  %s192_s20 = smov 8  }
  0x12   :  { %25 = dma.hbm_to_vmem [thread:$0]  %s255_s0, 256, %s20_s10, [#allocation3], %s191_s19, %s191_s19, %s192_s20  }
  0x13   :  { %s193_s23 = smov [#allocation5]   ;;  %s140_s27 = scalar_lea.hbm %s256_s1, 256 }
  0x14   :  { %s35_s24 = sshll.u32 %s193_s23, 4  ;;  %p141_p8 = scmp.ne.s32.totalorder %s256_s1, %s140_s27  ;;  %s36_s24 = int_to_ptr.vmem [resolvable:$true] %s35_s24 }
  0x15   :  { %p144_p9 = scmp.lt.u32.totalorder %s140_s27, %s256_s1 }
  0x17   :  { %p146_p10 = pnand %p144_p9, %p141_p8 }
  0x19   :  { %149 = shalt.err (!%p146_p10)
}
  0x1a   :  { %s150_s4 = scalar_lea.vmem %s36_s24, 256  ;;  %p155_p12 = scmp.lt.s32.totalorder %s36_s24, %s36_s24 }
  0x1b   :  { %p151_p11 = scmp.ne.s32.totalorder %s36_s24, %s150_s4  ;;  %p156_p13 = scmp.lt.s32.totalorder %s150_s4, %s150_s4 }
  0x1d   :  { %p157_p0 = por %p156_p13, %p155_p12 }
  0x1f   :  { %p158_p1 = pnand %p157_p0, %p151_p11 }
  0x21   :  { %161 = shalt.err (!%p158_p1)
}
  0x22   :  { %41 = dma.hbm_to_vmem [thread:$0]  %s256_s1, 256, %s36_s24, [#allocation6], %s191_s19, %s191_s19, %s192_s20  }
  0x23   :  { %184 = dma.done.wait [#allocation3], 256  }
  0x24   :  { %185 = vsyncadd [#allocation3], 4294967040 }
  0x25   :  { %186 = dma.done.wait [#allocation6], 256  }
  0x26   :  { %187 = vsyncadd [#allocation6], 4294967040  ;;  %v58_v0 = vld [vmem:[#allocation2] sm:$0xff]  ;;  %v59_v1 = vld [vmem:[#allocation2 + $0x8] sm:$0xff]  ;;  %s194_s1 = smov [#allocation7]  }
  0x27   :  { %v60_v2 = vmax.f32 %v58_v0, 1e-06  ;;  %v64_v3 = vld [vmem:[#allocation5] sm:$0xff]  ;;  %v61_v4 = vmax.f32 %v59_v1, 1e-06  ;;  %v65_v5 = vld [vmem:[#allocation5 + $0x8] sm:$0xff] }
  0x28   :  { %vm66_vm0 = vcmp.eq.f32.partialorder %v64_v3, 1.0  ;;  %vm67_vm1 = vcmp.eq.f32.partialorder %v65_v5, 1.0  ;;  %s95_s6 = sshll.u32 %s194_s1, 4  ;;  %s96_s6 = int_to_ptr.vmem [resolvable:$true] %s95_s6 }
  0x29   :  { %v62_v6 = vmin.f32 %v60_v2, 0.999999  ;;  %v63_v7 = vmin.f32 %v61_v4, 0.999999  ;;  %s162_s7 = scalar_lea.vmem %s96_s6, 256  ;;  %p167_p3 = scmp.lt.s32.totalorder %s96_s6, %s96_s6 }
  0x2a   :  { %p163_p2 = scmp.ne.s32.totalorder %s96_s6, %s162_s7  ;;  %p168_p4 = scmp.lt.s32.totalorder %s162_s7, %s162_s7 }
  0x2b   :  { %v68_v8 = vsub.f32 1.0, %v62_v6  ;;  %v69_v9 = vsub.f32 1.0, %v63_v7 }
  0x2c   :  { %p169_p5 = por %p168_p4, %p167_p3 }
  0x2d   :  { %v70_v10 = vsel %vm66_vm0, %v62_v6, %v68_v8  ;;  %v71_v11 = vsel %vm67_vm1, %v63_v7, %v69_v9 }
  0x2e   :  { %114 = vlog2.f32 %v70_v10  ;;  %v72_v12 = vsub.f32 1.0, %v70_v10  ;;  %v73_v13 = vsub.f32 1.0, %v71_v11  ;;  %p170_p6 = pnand %p169_p5, %p163_p2 }
  0x2f   :  { %116 = vlog2.f32 %v71_v11 }
  0x30   :  { %v74_v14 = vmul.f32 %v72_v12, %v72_v12  ;;  %v75_v15 = vmul.f32 %v73_v13, %v73_v13 }
  0x32   :  { %v76_v16 = vmul.f32 -0.25, %v74_v14  ;;  %v77_v18 = vmul.f32 -0.25, %v75_v15 }
  0x38   :  { %v115_v17 = vpop.eup %114 }
  0x39   :  { %v117_v19 = vpop.eup %116  ;;  %v79_v20 = vmul.f32 0.6931472, %v115_v17 }
  0x3a   :  { %v81_v21 = vmul.f32 0.6931472, %v117_v19 }
  0x3b   :  { %v82_v22 = vmul.f32 %v79_v20, %v76_v16 }
  0x3c   :  { %v83_v23 = vmul.f32 %v81_v21, %v77_v18 }
  0x3d   :  { %88 = vst [vmem:[#allocation7] sm:$0xff] %v82_v22 }
  0x3e   :  { %89 = vst [vmem:[#allocation7 + $0x8] sm:$0xff] %v83_v23 }
  0x3f   :  { %173 = shalt.err (!%p170_p6)
}
  0x40   :  { %s174_s10 = scalar_lea.hbm %s257_s2, 256 }
  0x41   :  { %p175_p7 = scmp.ne.s32.totalorder %s257_s2, %s174_s10  ;;  %p178_p8 = scmp.lt.u32.totalorder %s174_s10, %s257_s2 }
  0x43   :  { %p180_p9 = pnand %p178_p8, %p175_p7 }
  0x45   :  { %183 = shalt.err (!%p180_p9)
}
  0x46   :  { %101 = dma.vmem_to_hbm [thread:$0]  %s96_s6, 256, %s257_s2, [#allocation4], %s191_s19, %s191_s19, %s192_s20  }
  0x47   :  { %188 = dma.done.wait [#allocation4], 256  }
  0x48   :  { %189 = vsyncadd [#allocation4], 4294967040 }
  0x49   :  { %105 = vsyncpa [#allocation3], 1 }
  0x4a   :  { %106 = vsyncpa [#allocation6], 1 }
  0x4b   :  { %107 = vsyncpa [#allocation4], 1 }

</bundles_post_ra>
